<compile_context>
chip_gen: v5e
topology: v5e:2x2
jax: 0.10.0
libtpu: 0.0.40
codegen_flags: <defaults>
</compile_context>

<pallas_src>
import jax
import jax.numpy as jnp
from jax.experimental import pallas as pl
from jax.experimental.pallas import tpu as pltpu


def _round_up(x, m):
    return -(-x // m) * m


def _make_patches_kernel(k, s, ho, ho_pad):
    """k: kernel size, s: stride, ho: valid out rows, ho_pad: multiple of 8."""

    def kernel(x_ref, c_ref, out_ref):
        # x_ref   : (Nb, Hp_pad, Wp)   f32  -- Nb zero-padded input planes
        # c_ref   : (Wp, k*Wo)         bf16 -- stacked one-hot column select
        # out_ref : (Nb, k, Ho, k*Wo)  out  -- all k^2 shifts, lane-dense
        nb, _, wp = x_ref.shape
        cm = c_ref[...]                                    # bf16, entries 0/1
        for di in range(k):
            # Row shift di: free strided sublane slice, no FLOPs.
            rsel = pl.ds(di, ho_pad, stride=s) if s > 1 else pl.ds(di, ho_pad)
            rows = x_ref[:, rsel, :]                       # (Nb, ho_pad, Wp)
            # ho_pad % 8 == 0 -> the plane-batch merge is a layout no-op.
            lhs = rows.reshape(nb * ho_pad, wp)
            # Exact 3-way bf16 split of the f32 lhs.  rhs is one-hot, so every
            # partial matmul is exact and the f32 sum reproduces lhs exactly,
            # using 3 bf16 MXU passes instead of multi-pass f32.
            hi = lhs.astype(jnp.bfloat16)
            r1 = lhs - hi.astype(jnp.float32)
            mid = r1.astype(jnp.bfloat16)
            lo = (r1 - mid.astype(jnp.float32)).astype(jnp.bfloat16)
            val = jnp.dot(hi, cm, preferred_element_type=jnp.float32)
            val = val + jnp.dot(mid, cm, preferred_element_type=jnp.float32)
            val = val + jnp.dot(lo, cm, preferred_element_type=jnp.float32)
            val = val.reshape(nb, ho_pad, val.shape[-1])
            if ho_pad == ho:
                out_ref[:, di, :, :] = val.astype(out_ref.dtype)
            else:
                out_ref[:, di, :, :] = val[:, :ho, :].astype(out_ref.dtype)

    return kernel


def _vmem_policy():
    """(block-budget bytes, compiler vmem_limit_bytes) for the local chip."""
    cap = 64 * 1024 * 1024                # conservative default == v7x per-TC
    try:
        info = pltpu.get_tpu_info()
        cap = int(getattr(info, "vmem_capacity_bytes", cap)) or cap
    except Exception:
        pass
    if cap >= 100 * 1024 * 1024:          # v5e / v6e: 128 MiB physical VMEM
        return 48 * 1024 * 1024, 96 * 1024 * 1024
    return 24 * 1024 * 1024, 48 * 1024 * 1024


def _choose_plane_batch(n_planes, hp_pad, wp, k, ho, wo, ho_pad, vmem_budget):
    """How many (H, W) planes per grid step, and the resulting step count."""
    in_bytes = hp_pad * wp * 4
    out_bytes = k * k * ho * wo * 4
    # rough per-plane live temporaries of one di iteration (x2 safety margin)
    temp_bytes = 2 * (ho_pad * wp * 18 + ho_pad * k * wo * 8)
    bytes_per_plane = 2 * (in_bytes + out_bytes) + temp_bytes
    nb = max(1, min(n_planes, vmem_budget // bytes_per_plane))
    n_blocks = -(-n_planes // nb)
    # Prefer >= 4 grid steps (>= 2 per TensorCore on megacore parts) when the
    # problem is large enough; shrinking nb never exceeds the VMEM-chosen size.
    if n_planes >= 4 and n_blocks < 4:
        nb = max(1, -(-n_planes // 4))
        n_blocks = -(-n_planes // nb)
    # Prefer an even step count so a 2-TC split is load-balanced.
    if n_blocks > 1 and n_blocks % 2:
        nb_even = max(1, -(-n_planes // (n_blocks + 1)))
        if (-(-n_planes // nb_even)) % 2 == 0:
            nb = nb_even
            n_blocks = -(-n_planes // nb)
    return nb, n_blocks


def patches_kernel_3d(x, kernelsize, kernelstride, kernelpadding=0,
                      *, out_dtype=jnp.float32, native_layout=False):
    """Forward pass of PatchesKernel3D.

    x: (B, C, H, W) float -> (B, Ho*Wo, C, kernelsize**2) float32 (default).
    native_layout=True returns the kernel-native (B, C, k, Ho, k, Wo) tensor
    (lets a fused consumer skip the full-tensor transpose).
    out_dtype=jnp.bfloat16 halves output writeback if the consumer allows it.
    """
    k, s, p = kernelsize, kernelstride, kernelpadding
    K2 = k * k
    B, C, H, W = x.shape

    # torch.amp.custom_fwd(cast_inputs=torch.float32)
    x = x.astype(jnp.float32)

    # conv2d zero padding (glue, as in F.conv2d(padding=p)).
    if p:
        x = jnp.pad(x, ((0, 0), (0, 0), (p, p), (p, p)))
    Hp, Wp = H + 2 * p, W + 2 * p
    Ho = (Hp - k) // s + 1
    Wo = (Wp - k) // s + 1

    # Pad the output-row count to a sublane multiple so the in-kernel
    # (Nb, ho_pad, Wp) -> (Nb*ho_pad, Wp) merge feeding the MXU is a layout
    # no-op; zero-pad the plane height so every strided row slice is in bounds.
    Ho_pad = _round_up(Ho, 8)
    Hp_need = k + (Ho_pad - 1) * s
    Hp_pad = max(Hp, Hp_need)

    N = B * C
    x_planes = x.reshape(N, Hp, Wp)
    if Hp_pad != Hp:
        x_planes = jnp.pad(x_planes, ((0, 0), (0, Hp_pad - Hp), (0, 0)))

    # Stacked one-hot column-selection matrix (the identity conv weight
    # restricted to the lane dim): Cm[w, dj*Wo + wo] = 1 iff w == wo*s + dj.
    # 0/1 is exact in bf16 and bf16 halves its DMA/VMEM footprint.
    wo_idx = jnp.arange(Wo)
    Cm = jnp.concatenate(
        [jax.nn.one_hot(wo_idx * s + dj, Wp, dtype=jnp.float32).T
         for dj in range(k)], axis=1).astype(jnp.bfloat16)   # (Wp, k*Wo)

    # The module's bias is identically zero -> dropped entirely.

    vmem_budget, vmem_limit = _vmem_policy()
    Nb, n_blocks = _choose_plane_batch(
        N, Hp_pad, Wp, k, Ho, Wo, Ho_pad, vmem_budget)
    Npad = n_blocks * Nb
    if Npad != N:
        x_planes = jnp.pad(x_planes, ((0, Npad - N), (0, 0), (0, 0)))

    conv = pl.pallas_call(
        _make_patches_kernel(k, s, Ho, Ho_pad),
        out_shape=jax.ShapeDtypeStruct((Npad, k, Ho, k * Wo), out_dtype),
        grid=(n_blocks,),
        in_specs=[
            pl.BlockSpec((Nb, Hp_pad, Wp), lambda g: (g, 0, 0)),
            pl.BlockSpec((Wp, k * Wo), lambda g: (0, 0)),
        ],
        out_specs=pl.BlockSpec((Nb, k, Ho, k * Wo), lambda g: (g, 0, 0, 0)),
        compiler_params=pltpu.CompilerParams(
            dimension_semantics=("parallel",),
            vmem_limit_bytes=vmem_limit,
        ),
    )(x_planes, Cm)

    if Npad != N:
        conv = conv[:N]

    # conv[n, di, ho, dj*Wo + wo] == x_pad[n, ho*s + di, wo*s + dj].
    t = conv.reshape(B, C, k, Ho, k, Wo)            # (b, c, di, ho, dj, wo)
    if native_layout:
        return t
    # PyTorch tail (permute/reshape/permute) folded into ONE transpose pass.
    t = jnp.transpose(t, (0, 3, 5, 1, 2, 4))        # (b, ho, wo, c, di, dj)
    return t.reshape(B, Ho * Wo, C, K2)


def _reference_forward(x, kernelsize, kernelstride, kernelpadding=0):
    """Pure-JAX (slice based) reference of the PyTorch forward."""
    k, s, p = kernelsize, kernelstride, kernelpadding
    K2 = k * k
    B, C, H, W = x.shape
    x = x.astype(jnp.float32)
    if p:
        x = jnp.pad(x, ((0, 0), (0, 0), (p, p), (p, p)))
    Hp, Wp = H + 2 * p, W + 2 * p
    Ho = (Hp - k) // s + 1
    Wo = (Wp - k) // s + 1
    patches = []
    for di in range(k):
        for dj in range(k):
            patches.append(
                x[:, :, di:di + (Ho - 1) * s + 1:s, dj:dj + (Wo - 1) * s + 1:s])
    conv = jnp.stack(patches, axis=2)                       # (B, C, K2, Ho, Wo)
    conv = conv.reshape(B * C, K2, Ho, Wo)                  # conv2d output
    out = conv.transpose(0, 2, 3, 1).reshape(B, C, Ho * Wo, K2)
    return out.transpose(0, 2, 1, 3)                        # (B, P, C, K2)


if __name__ == "__main__":
    key = jax.random.PRNGKey(0)

    configs = [
        # (B, C, H, W, kernelsize, kernelstride, kernelpadding)
        (2, 4, 16, 16, 4, 2, 1),   # Ho % 8 == 0, strided rows, >=4 grid steps
        (2, 3, 16, 16, 3, 1, 0),   # Ho = 14 -> padded-row merged path, s = 1
        (1, 3, 16, 16, 4, 2, 1),   # B*C=3: single step, no padding games
        (2, 2, 20, 20, 5, 3, 1),   # Ho = 6 -> padded rows with stride > 1
    ]
    for i, (B, C, H, W, ks, st, pad) in enumerate(configs):
        key, sub = jax.random.split(key)
        x = jax.random.normal(sub, (B, C, H, W), dtype=jnp.float32)

        out = jax.block_until_ready(patches_kernel_3d(x, ks, st, pad))
        ref = _reference_forward(x, ks, st, pad)

        Ho = (H + 2 * pad - ks) // st + 1
        Wo = (W + 2 * pad - ks) // st + 1
        assert out.shape == (B, Ho * Wo, C, ks * ks), (i, out.shape)
        assert out.dtype == jnp.float32
        assert jnp.allclose(out, ref, atol=1e-5, rtol=1e-5), f"mismatch cfg {i}"

    print("KERNEL_OK")
</pallas_src>

<mosaic_0001>
module attributes {stable_mosaic.version = 11 : i64} {
  func.func @kernel(%arg0: i32, %arg1: memref<2x18x18xf32, #tpu.memory_space<vmem>>, %arg2: memref<18x32xbf16, #tpu.memory_space<vmem>>, %arg3: memref<2x4x8x32xf32, #tpu.memory_space<vmem>>) attributes {dimension_semantics = [#tpu.dimension_semantics<parallel>], iteration_bounds = array<i64: 4>, scalar_prefetch = 0 : i64, scratch_operands = 0 : i64, tpu.core_type = #tpu.core_type<tc>, window_params = [{transform_indices = @transform_0, window_bounds = array<i64: 2, 18, 18>}, {pipeline_mode = #tpu.pipeline_mode<synchronous>, transform_indices = @transform_1, window_bounds = array<i64: 18, 32>}, {transform_indices = @transform_2, window_bounds = array<i64: 2, 4, 8, 32>}]} {
    %c0 = arith.constant 0 : index
    %c0_0 = arith.constant 0 : index
    %0 = vector.load %arg2[%c0, %c0_0] : memref<18x32xbf16, #tpu.memory_space<vmem>>, vector<18x32xbf16>
    %c0_1 = arith.constant 0 : index
    %c0_2 = arith.constant 0 : index
    %c0_3 = arith.constant 0 : index
    %1 = tpu.strided_load %arg1[%c0_1, %c0_2, %c0_3] {strides = array<i32: 1, 2, 1>} : memref<2x18x18xf32, #tpu.memory_space<vmem>>, vector<2x8x18xf32>
    %2 = vector.shape_cast %1 : vector<2x8x18xf32> to vector<16x18xf32>
    %3 = arith.truncf %2 : vector<16x18xf32> to vector<16x18xbf16>
    %4 = arith.extf %3 : vector<16x18xbf16> to vector<16x18xf32>
    %5 = arith.subf %2, %4 : vector<16x18xf32>
    %6 = arith.truncf %5 : vector<16x18xf32> to vector<16x18xbf16>
    %7 = arith.extf %6 : vector<16x18xbf16> to vector<16x18xf32>
    %8 = arith.subf %5, %7 : vector<16x18xf32>
    %9 = arith.truncf %8 : vector<16x18xf32> to vector<16x18xbf16>
    %cst = arith.constant dense<0.000000e+00> : vector<16x32xf32>
    %10 = tpu.matmul %3, %0, %cst {dimension_numbers = #tpu.dot_dimension_numbers<[1], [0], [0], [1], [0, 0, 1, 1], [], []>} : vector<16x18xbf16>, vector<18x32xbf16>, vector<16x32xf32> -> vector<16x32xf32>
    %cst_4 = arith.constant dense<0.000000e+00> : vector<16x32xf32>
    %11 = tpu.matmul %6, %0, %cst_4 {dimension_numbers = #tpu.dot_dimension_numbers<[1], [0], [0], [1], [0, 0, 1, 1], [], []>} : vector<16x18xbf16>, vector<18x32xbf16>, vector<16x32xf32> -> vector<16x32xf32>
    %12 = arith.addf %10, %11 : vector<16x32xf32>
    %cst_5 = arith.constant dense<0.000000e+00> : vector<16x32xf32>
    %13 = tpu.matmul %9, %0, %cst_5 {dimension_numbers = #tpu.dot_dimension_numbers<[1], [0], [0], [1], [0, 0, 1, 1], [], []>} : vector<16x18xbf16>, vector<18x32xbf16>, vector<16x32xf32> -> vector<16x32xf32>
    %14 = arith.addf %12, %13 : vector<16x32xf32>
    %15 = vector.shape_cast %14 : vector<16x32xf32> to vector<2x8x32xf32>
    %c0_6 = arith.constant 0 : index
    %c0_7 = arith.constant 0 : index
    %c0_8 = arith.constant 0 : index
    %c0_9 = arith.constant 0 : index
    %16 = vector.load %arg3[%c0_6, %c0_7, %c0_8, %c0_9] : memref<2x4x8x32xf32, #tpu.memory_space<vmem>>, vector<2x1x8x32xf32>
    %17 = vector.shape_cast %16 : vector<2x1x8x32xf32> to vector<2x8x32xf32>
    %18 = vector.shape_cast %15 : vector<2x8x32xf32> to vector<2x1x8x32xf32>
    tpu.vector_store %arg3[%c0_6, %c0_7, %c0_8, %c0_9], %18 {strides = array<i32>} : memref<2x4x8x32xf32, #tpu.memory_space<vmem>>, vector<2x1x8x32xf32>,
    %c0_10 = arith.constant 0 : index
    %c1 = arith.constant 1 : index
    %c0_11 = arith.constant 0 : index
    %19 = tpu.strided_load %arg1[%c0_10, %c1, %c0_11] {strides = array<i32: 1, 2, 1>} : memref<2x18x18xf32, #tpu.memory_space<vmem>>, vector<2x8x18xf32>
    %20 = vector.shape_cast %19 : vector<2x8x18xf32> to vector<16x18xf32>
    %21 = arith.truncf %20 : vector<16x18xf32> to vector<16x18xbf16>
    %22 = arith.extf %21 : vector<16x18xbf16> to vector<16x18xf32>
    %23 = arith.subf %20, %22 : vector<16x18xf32>
    %24 = arith.truncf %23 : vector<16x18xf32> to vector<16x18xbf16>
    %25 = arith.extf %24 : vector<16x18xbf16> to vector<16x18xf32>
    %26 = arith.subf %23, %25 : vector<16x18xf32>
    %27 = arith.truncf %26 : vector<16x18xf32> to vector<16x18xbf16>
    %cst_12 = arith.constant dense<0.000000e+00> : vector<16x32xf32>
    %28 = tpu.matmul %21, %0, %cst_12 {dimension_numbers = #tpu.dot_dimension_numbers<[1], [0], [0], [1], [0, 0, 1, 1], [], []>} : vector<16x18xbf16>, vector<18x32xbf16>, vector<16x32xf32> -> vector<16x32xf32>
    %cst_13 = arith.constant dense<0.000000e+00> : vector<16x32xf32>
    %29 = tpu.matmul %24, %0, %cst_13 {dimension_numbers = #tpu.dot_dimension_numbers<[1], [0], [0], [1], [0, 0, 1, 1], [], []>} : vector<16x18xbf16>, vector<18x32xbf16>, vector<16x32xf32> -> vector<16x32xf32>
    %30 = arith.addf %28, %29 : vector<16x32xf32>
    %cst_14 = arith.constant dense<0.000000e+00> : vector<16x32xf32>
    %31 = tpu.matmul %27, %0, %cst_14 {dimension_numbers = #tpu.dot_dimension_numbers<[1], [0], [0], [1], [0, 0, 1, 1], [], []>} : vector<16x18xbf16>, vector<18x32xbf16>, vector<16x32xf32> -> vector<16x32xf32>
    %32 = arith.addf %30, %31 : vector<16x32xf32>
    %33 = vector.shape_cast %32 : vector<16x32xf32> to vector<2x8x32xf32>
    %c0_15 = arith.constant 0 : index
    %c1_16 = arith.constant 1 : index
    %c0_17 = arith.constant 0 : index
    %c0_18 = arith.constant 0 : index
    %34 = vector.load %arg3[%c0_15, %c1_16, %c0_17, %c0_18] : memref<2x4x8x32xf32, #tpu.memory_space<vmem>>, vector<2x1x8x32xf32>
    %35 = vector.shape_cast %34 : vector<2x1x8x32xf32> to vector<2x8x32xf32>
    %36 = vector.shape_cast %33 : vector<2x8x32xf32> to vector<2x1x8x32xf32>
    tpu.vector_store %arg3[%c0_15, %c1_16, %c0_17, %c0_18], %36 {strides = array<i32>} : memref<2x4x8x32xf32, #tpu.memory_space<vmem>>, vector<2x1x8x32xf32>,
    %c0_19 = arith.constant 0 : index
    %c2 = arith.constant 2 : index
    %c0_20 = arith.constant 0 : index
    %37 = tpu.strided_load %arg1[%c0_19, %c2, %c0_20] {strides = array<i32: 1, 2, 1>} : memref<2x18x18xf32, #tpu.memory_space<vmem>>, vector<2x8x18xf32>
    %38 = vector.shape_cast %37 : vector<2x8x18xf32> to vector<16x18xf32>
    %39 = arith.truncf %38 : vector<16x18xf32> to vector<16x18xbf16>
    %40 = arith.extf %39 : vector<16x18xbf16> to vector<16x18xf32>
    %41 = arith.subf %38, %40 : vector<16x18xf32>
    %42 = arith.truncf %41 : vector<16x18xf32> to vector<16x18xbf16>
    %43 = arith.extf %42 : vector<16x18xbf16> to vector<16x18xf32>
    %44 = arith.subf %41, %43 : vector<16x18xf32>
    %45 = arith.truncf %44 : vector<16x18xf32> to vector<16x18xbf16>
    %cst_21 = arith.constant dense<0.000000e+00> : vector<16x32xf32>
    %46 = tpu.matmul %39, %0, %cst_21 {dimension_numbers = #tpu.dot_dimension_numbers<[1], [0], [0], [1], [0, 0, 1, 1], [], []>} : vector<16x18xbf16>, vector<18x32xbf16>, vector<16x32xf32> -> vector<16x32xf32>
    %cst_22 = arith.constant dense<0.000000e+00> : vector<16x32xf32>
    %47 = tpu.matmul %42, %0, %cst_22 {dimension_numbers = #tpu.dot_dimension_numbers<[1], [0], [0], [1], [0, 0, 1, 1], [], []>} : vector<16x18xbf16>, vector<18x32xbf16>, vector<16x32xf32> -> vector<16x32xf32>
    %48 = arith.addf %46, %47 : vector<16x32xf32>
    %cst_23 = arith.constant dense<0.000000e+00> : vector<16x32xf32>
    %49 = tpu.matmul %45, %0, %cst_23 {dimension_numbers = #tpu.dot_dimension_numbers<[1], [0], [0], [1], [0, 0, 1, 1], [], []>} : vector<16x18xbf16>, vector<18x32xbf16>, vector<16x32xf32> -> vector<16x32xf32>
    %50 = arith.addf %48, %49 : vector<16x32xf32>
    %51 = vector.shape_cast %50 : vector<16x32xf32> to vector<2x8x32xf32>
    %c0_24 = arith.constant 0 : index
    %c2_25 = arith.constant 2 : index
    %c0_26 = arith.constant 0 : index
    %c0_27 = arith.constant 0 : index
    %52 = vector.load %arg3[%c0_24, %c2_25, %c0_26, %c0_27] : memref<2x4x8x32xf32, #tpu.memory_space<vmem>>, vector<2x1x8x32xf32>
    %53 = vector.shape_cast %52 : vector<2x1x8x32xf32> to vector<2x8x32xf32>
    %54 = vector.shape_cast %51 : vector<2x8x32xf32> to vector<2x1x8x32xf32>
    tpu.vector_store %arg3[%c0_24, %c2_25, %c0_26, %c0_27], %54 {strides = array<i32>} : memref<2x4x8x32xf32, #tpu.memory_space<vmem>>, vector<2x1x8x32xf32>,
    %c0_28 = arith.constant 0 : index
    %c3 = arith.constant 3 : index
    %c0_29 = arith.constant 0 : index
    %55 = tpu.strided_load %arg1[%c0_28, %c3, %c0_29] {strides = array<i32: 1, 2, 1>} : memref<2x18x18xf32, #tpu.memory_space<vmem>>, vector<2x8x18xf32>
    %56 = vector.shape_cast %55 : vector<2x8x18xf32> to vector<16x18xf32>
    %57 = arith.truncf %56 : vector<16x18xf32> to vector<16x18xbf16>
    %58 = arith.extf %57 : vector<16x18xbf16> to vector<16x18xf32>
    %59 = arith.subf %56, %58 : vector<16x18xf32>
    %60 = arith.truncf %59 : vector<16x18xf32> to vector<16x18xbf16>
    %61 = arith.extf %60 : vector<16x18xbf16> to vector<16x18xf32>
    %62 = arith.subf %59, %61 : vector<16x18xf32>
    %63 = arith.truncf %62 : vector<16x18xf32> to vector<16x18xbf16>
    %cst_30 = arith.constant dense<0.000000e+00> : vector<16x32xf32>
    %64 = tpu.matmul %57, %0, %cst_30 {dimension_numbers = #tpu.dot_dimension_numbers<[1], [0], [0], [1], [0, 0, 1, 1], [], []>} : vector<16x18xbf16>, vector<18x32xbf16>, vector<16x32xf32> -> vector<16x32xf32>
    %cst_31 = arith.constant dense<0.000000e+00> : vector<16x32xf32>
    %65 = tpu.matmul %60, %0, %cst_31 {dimension_numbers = #tpu.dot_dimension_numbers<[1], [0], [0], [1], [0, 0, 1, 1], [], []>} : vector<16x18xbf16>, vector<18x32xbf16>, vector<16x32xf32> -> vector<16x32xf32>
    %66 = arith.addf %64, %65 : vector<16x32xf32>
    %cst_32 = arith.constant dense<0.000000e+00> : vector<16x32xf32>
    %67 = tpu.matmul %63, %0, %cst_32 {dimension_numbers = #tpu.dot_dimension_numbers<[1], [0], [0], [1], [0, 0, 1, 1], [], []>} : vector<16x18xbf16>, vector<18x32xbf16>, vector<16x32xf32> -> vector<16x32xf32>
    %68 = arith.addf %66, %67 : vector<16x32xf32>
    %69 = vector.shape_cast %68 : vector<16x32xf32> to vector<2x8x32xf32>
    %c0_33 = arith.constant 0 : index
    %c3_34 = arith.constant 3 : index
    %c0_35 = arith.constant 0 : index
    %c0_36 = arith.constant 0 : index
    %70 = vector.load %arg3[%c0_33, %c3_34, %c0_35, %c0_36] : memref<2x4x8x32xf32, #tpu.memory_space<vmem>>, vector<2x1x8x32xf32>
    %71 = vector.shape_cast %70 : vector<2x1x8x32xf32> to vector<2x8x32xf32>
    %72 = vector.shape_cast %69 : vector<2x8x32xf32> to vector<2x1x8x32xf32>
    tpu.vector_store %arg3[%c0_33, %c3_34, %c0_35, %c0_36], %72 {strides = array<i32>} : memref<2x4x8x32xf32, #tpu.memory_space<vmem>>, vector<2x1x8x32xf32>,
    return
  }
  func.func @transform_0(%arg0: i32) -> (i32, i32, i32) {
    %c0_i32 = arith.constant 0 : i32
    %c0_i32_0 = arith.constant 0 : i32
    %c0_i32_1 = arith.constant 0 : i32
    return %arg0, %c0_i32, %c0_i32_0 : i32, i32, i32
  }
  func.func @transform_1(%arg0: i32) -> (i32, i32) {
    %c0_i32 = arith.constant 0 : i32
    %c0_i32_0 = arith.constant 0 : i32
    %c0_i32_1 = arith.constant 0 : i32
    return %c0_i32, %c0_i32_0 : i32, i32
  }
  func.func @transform_2(%arg0: i32) -> (i32, i32, i32, i32) {
    %c0_i32 = arith.constant 0 : i32
    %c0_i32_0 = arith.constant 0 : i32
    %c0_i32_1 = arith.constant 0 : i32
    %c0_i32_2 = arith.constant 0 : i32
    return %arg0, %c0_i32, %c0_i32_0, %c0_i32_1 : i32, i32, i32, i32
  }
}

</mosaic_0001>

<bundles_post_ra>
// kernel: tpu_custom_call.1
= control target key start
LH: loop header
LB: loop body
LE: loop exit
PB: predicated region body
PF: predicated region fallthrough
CT: control target
= control target key end

     0   :  { %7 = vsyncpa [#allocation3], 0  ;;  %s919_s0 = inlined_call_operand.vmem [shape: f32[8,18,18], index: 0, kind: input, shape index: {}]   ;;  %s920_s1 = inlined_call_operand.vmem [shape: bf16[18,32], index: 1, kind: input, shape index: {}]   ;;  %s921_s2 = inlined_call_operand.hbm [shape: f32[8,4,8,32], index: 2, kind: output, shape index: {}]  }
   0x1   :  { %9 = vsyncpa [#allocation3 + $0x1], 0  ;;  %s744_s9 = smov 0   ;;  %s746_s10 = smov 0  }
   0x2   :  { %s748_s11 = smov 0   ;;  %s750_s12 = smov 0  }
   0x3 LB: > { %s765_s13 = sadd.s32 4294967295, %s725_s12   ;;  %s576_s14 = sadd.s32 4294967294, %s725_s12   ;;  %s725_s12 = sphi %s750_s12, %s927_s12   ;;  %s721_s11 = sphi %s748_s11, %s926_s11   ;;  %s717_s10 = sphi %s746_s10, %s925_s10   ;;  %s713_s9 = sphi %s744_s9, %s924_s9  }
   0x4   : > { %s769_s15 = sadd.s32 1, %s725_s12   ;;  %s69_s16 = sadd.s32 1, %s721_s11 }
   0x5   : > { %s66_s17 = ssub.s32 %s725_s12, %s769_s15  ;;  %p79_p0 = scmp.ne.s32.totalorder %s721_s11, %s717_s10 }
   0x6   : > { %p67_p1 = scmp.eq.s32.totalorder %s66_s17, 0  ;;  %p80_p2 = scmp.eq.s32.totalorder %s765_s13, 3 }
   0x7   : > { %p85_p3 = scmp.ne.s32.totalorder %s717_s10, %s713_s9  ;;  %p86_p4 = scmp.eq.s32.totalorder %s576_s14, 3 }
   0x8   : > { %s780_s18 = scalar_select %p67_p1, %s721_s11, %s69_s16  }
   0x9   : > { %p782_p5 = por %p80_p2, %p79_p0  ;;  %p786_p6 = por %p86_p4, %p85_p3 }
   0xa   : > { %p579_p7 = scmp.ge.s32.totalorder %s725_s12, 1  ;;  %p117_p8 = scmp.lt.s32.totalorder %s725_s12, 5 }
   0xc   : > { %p118_p9 = pnand %p579_p7, %p117_p8 }
   0xd   : > { %s581_s23 = sshll.u32 (!%p118_p9), %s765_s13, 1  ;;  %s137_s30 = sand.u32 (!%p118_p9), 1, %s717_s10  }
   0xe   : > { %121 = sbr.rel (%p118_p9) target bundleno = 220 (0xdc), region = 28  ;;  %p141_p10 = scmp.lt.s32.totalorder (!%p118_p9), %s581_s23, 7 }
   0xf   : > { %s580_s3 = sshll.u32 (!%p118_p9), %s137_s30, 6  ;;  %s620_s5 = sshll.u32 (!%p118_p9), %s765_s13, 6 }
  0x10   : > { %s867_s4 = scalar_lea.vmem (!%p118_p9), [#allocation2], %s580_s3  ;;  %s510_s8 = scalar_lea.hbm (!%p118_p9), %s921_s2, %s620_s5 }
  0x11   : > { %s511_s14 = sshll.u32 (!%p118_p9), %s867_s4, 4  ;;  %s513_s16 = sshll.u32 (!%p118_p9), %s510_s8, 4  ;;  %s512_s14 = int_to_ptr.vmem [resolvable:$true] %s511_s14  ;;  %s514_s16 = int_to_ptr.hbm [resolvable:$true] %s513_s16 }
  0x12   : > { %s498_s13 = scalar_lea.sflag (!%p118_p9), [#allocation3], %s137_s30  ;;  %s677_s17 = sshra.s32 (!%p118_p9), %s514_s16, 4  ;;  %s678_s17 = int_to_ptr.hbm [resolvable:$true] %s677_s17 }
  0x13   : > { %v151_v0 = vld [vmem:[%s920_s1 + $0x8] sm:$0x1]  ;;  %vm186_vm0 = vcmask 1040384   ;;  %s929_s23 = smov (!%p141_p10, %s581_s23), 7  ;;  %v803_v4 = vld [vmem:[%s920_s1] sm:$0xff]  ;;  %vm182_vm1 = vcmask 146432   ;;  %p684_p0 = scmp.lt.s32.totalorder %s678_s17, %s921_s2 }
  0x14   : > { %v178_v1 = vunpack.c.l.b16 %v151_v0  ;;  %s621_s24 = smul.u32 24, %s929_s23  ;;  %vm245_vm2 = vcmask 261120   ;;  %s679_s21 = scalar_lea.hbm %s678_s17, 64 }
  0x15   : > { %p680_p11 = scmp.ne.s32.totalorder %s678_s17, %s679_s21 }
  0x16   : > { %v180_v2 = vpack.c.b16 %v178_v1, %v178_v1  ;;  %s810_s29 = scalar_lea.vmem %s919_s0, %s621_s24  ;;  %s683_s24 = scalar_lea.hbm %s921_s2, 256 }
  0x17   : > { %v152_v5 = vld [vmem:[%s810_s29] ss:$2 sm:$0xff]  ;;  %v591_v7 = vld [vmem:[%s810_s29 + $0x1] ss:$2 sm:$0xff]  ;;  %p681_p12 = pnand %p680_p11, %p782_p5  ;;  %p685_p1 = scmp.lt.s32.totalorder %s683_s24, %s679_s21 }
  0x18   : > { %v796_v3 = vsel %vm186_vm0, %v180_v2, 0  ;;  %v583_v6 = vld [vmem:[%s810_s29 + $0x18] ss:$2 sm:$0xff]  ;;  %v155_v8 = vpack.c.bf16 %v152_v5, %v152_v5  ;;  %v592_v10 = vld [vmem:[%s810_s29 + $0x19] ss:$2 sm:$0xff]  ;;  %v816_v11 = vpack.c.bf16 %v591_v7, %v591_v7 }
  0x19   : > { %196 = vmatpush.bf16.msra.mxu0 %v796_v3  ;;  %218 = vmatpush.bf16.msra.mxu1 %v796_v3  ;;  %v156_v9 = vpack.c.bf16 %v583_v6, %v583_v6  ;;  %v598_v12 = vld [vmem:[%s810_s29 + $0x2] ss:$2 sm:$0xff]  ;;  %v821_v13 = vpack.c.bf16 %v592_v10, %v592_v10  ;;  %v605_v48 = vld [vmem:[%s810_s29 + $0x3] ss:$2 sm:$0xff]  ;;  %p682_p13 = pneg %p681_p12  ;;  %p686_p2 = por %p685_p1, %p684_p0 }
  0x1a   : > { %279 = vmatpush.bf16.msra.mxu3 %v796_v3  ;;  %235 = vmatpush.bf16.msra.mxu2 %v796_v3  ;;  %v157_v14 = vunpack.c.l.bf16 %v155_v8  ;;  %v206_v16 = vunpack.c.l.b16 %v155_v8  ;;  %v599_v18 = vld [vmem:[%s810_s29 + $0x1a] ss:$2 sm:$0xff]  ;;  %v254_v19 = vunpack.c.l.bf16 %v816_v11  ;;  %v830_v21 = vpack.c.bf16 %v598_v12, %v598_v12  ;;  %v606_v49 = vld [vmem:[%s810_s29 + $0x1b] ss:$2 sm:$0xff] }
  0x1b   : > { %v158_v15 = vunpack.c.l.bf16 %v156_v9  ;;  %v207_v17 = vunpack.c.l.b16 %v156_v9  ;;  %v255_v20 = vunpack.c.l.bf16 %v821_v13  ;;  %v336_v27 = vpack.c.bf16 %v599_v18, %v599_v18  ;;  %p687_p3 = pnand %p686_p2, %p682_p13 }
  0x1c   : > { %v159_v22 = vsub.f32 %v152_v5, %v157_v14  ;;  %v256_v25 = vsub.f32 %v591_v7, %v254_v19  ;;  %v337_v32 = vunpack.c.l.bf16 %v830_v21  ;;  %v418_v53 = vpack.c.bf16 %v605_v48, %v605_v48 }
  0x1d   : > { %197 = vmatpush.bf16.msra.mxu0 %v803_v4  ;;  %219 = vmatpush.bf16.msra.mxu1 %v803_v4  ;;  %v160_v23 = vsub.f32 %v583_v6, %v158_v15  ;;  %v208_v24 = vpack.c.b16 %v207_v17, %v206_v16  ;;  %v257_v26 = vsub.f32 %v592_v10, %v255_v20  ;;  %v338_v40 = vunpack.c.l.bf16 %v336_v27 }
  0x1e   : > { %280 = vmatpush.bf16.msra.mxu3 %v803_v4  ;;  %236 = vmatpush.bf16.msra.mxu2 %v803_v4  ;;  %v161_v28 = vpack.c.bf16 %v159_v22, %v159_v22  ;;  %v258_v30 = vpack.c.bf16 %v256_v25, %v256_v25  ;;  %v339_v47 = vsub.f32 %v598_v12, %v337_v32  ;;  %v289_v58 = vunpack.c.l.b16 %v816_v11 }
  0x1f   : > { %v162_v29 = vpack.c.bf16 %v160_v23, %v160_v23  ;;  %v259_v31 = vpack.c.bf16 %v257_v26, %v257_v26  ;;  %v340_v52 = vsub.f32 %v599_v18, %v338_v40  ;;  %v419_v54 = vpack.c.bf16 %v606_v49, %v606_v49 }
  0x20   : > { %589 = vmatmul.msk.bf16.vlgmr.msra.gmra.mxu1 %vm182_vm1, %v208_v24  ;;  %v170_v33 = vunpack.c.l.b16 %v161_v28  ;;  %v163_v35 = vunpack.c.l.bf16 %v161_v28  ;;  %v260_v37 = vunpack.c.l.bf16 %v258_v30  ;;  %v267_v38 = vunpack.c.l.b16 %v258_v30 }
  0x21   : > { %318 = vmatpush.bf16.msrb.mxu1 %v796_v3  ;;  %301 = vmatpush.bf16.msrb.mxu0 %v796_v3  ;;  %v171_v34 = vunpack.c.l.b16 %v162_v29  ;;  %v164_v36 = vunpack.c.l.bf16 %v162_v29  ;;  %v268_v39 = vunpack.c.l.b16 %v259_v31  ;;  %v261_v42 = vunpack.c.l.bf16 %v259_v31 }
  0x22   : > { %362 = vmatpush.bf16.msrb.mxu2 %v796_v3  ;;  %384 = vmatpush.bf16.msrb.mxu3 %v796_v3  ;;  %v165_v43 = vsub.f32 %v159_v22, %v163_v35  ;;  %v262_v50 = vsub.f32 %v256_v25, %v260_v37  ;;  %v341_v56 = vpack.c.bf16 %v339_v47, %v339_v47  ;;  %v290_v59 = vunpack.c.l.b16 %v821_v13 }
  0x23   : > { %v172_v41 = vpack.c.b16 %v171_v34, %v170_v33  ;;  %v166_v44 = vsub.f32 %v160_v23, %v164_v36  ;;  %v269_v45 = vpack.c.b16 %v268_v39, %v267_v38  ;;  %v263_v51 = vsub.f32 %v257_v26, %v261_v42 }
  0x24   : > { %v342_v57 = vpack.c.bf16 %v340_v52, %v340_v52  ;;  %v420_v60 = vunpack.c.l.bf16 %v418_v53  ;;  %v421_v61 = vunpack.c.l.bf16 %v419_v54  ;;  %v372_v62 = vunpack.c.l.b16 %v830_v21 }
  0x25   : > { %302 = vmatpush.bf16.msrb.mxu0 %v803_v4  ;;  %319 = vmatpush.bf16.msrb.mxu1 %v803_v4  ;;  %v167_v46 = vpack.c.bf16 %v166_v44, %v165_v43  ;;  %v264_v55 = vpack.c.bf16 %v263_v51, %v262_v50  ;;  %v373_v63 = vunpack.c.l.b16 %v336_v27  ;;  %v350_v0 = vunpack.c.l.b16 %v341_v56 }
  0x26   : > { %363 = vmatpush.bf16.msrb.mxu2 %v803_v4  ;;  %385 = vmatpush.bf16.msrb.mxu3 %v803_v4  ;;  %v351_v1 = vunpack.c.l.b16 %v342_v57  ;;  %v291_v2 = vpack.c.b16 %v290_v59, %v289_v58  ;;  %v423_v5 = vsub.f32 %v606_v49, %v421_v61  ;;  %v343_v11 = vunpack.c.l.bf16 %v341_v56 }
  0x27   : > { %588 = vmatmul.msk.bf16.vlgmr.msra.gmra.mxu0 %vm182_vm1, %v172_v41  ;;  %593 = vmatmul.msk.bf16.vlgmr.msra.gmra.mxu3 %vm182_vm1, %v269_v45  ;;  %v374_v6 = vpack.c.b16 %v373_v63, %v372_v62  ;;  %v344_v12 = vunpack.c.l.bf16 %v342_v57  ;;  %v455_v20 = vunpack.c.l.b16 %v418_v53  ;;  %v456_v21 = vunpack.c.l.b16 %v419_v54 }
  0x28   : > { %590 = vmatmul.msk.bf16.vlgmr.msra.gmra.mxu2 %vm182_vm1, %v167_v46  ;;  %v352_v7 = vpack.c.b16 %v351_v1, %v350_v0  ;;  %v425_v8 = vpack.c.bf16 %v423_v5, %v423_v5  ;;  %v345_v16 = vsub.f32 %v339_v47, %v343_v11 }
  0x29   : > { %445 = vmatpush.bf16.msra.mxu1 %v796_v3  ;;  %401 = vmatpush.bf16.msra.mxu0 %v796_v3  ;;  %v346_v17 = vsub.f32 %v340_v52, %v344_v12  ;;  %v457_v24 = vpack.c.b16 %v456_v21, %v455_v20 }
  0x2a   : > { %484 = vmatpush.bf16.msra.mxu3 %v796_v3  ;;  %467 = vmatpush.bf16.msra.mxu2 %v796_v3  ;;  %v422_v3 = vsub.f32 %v605_v48, %v420_v60  ;;  %v434_v10 = vunpack.c.l.b16 %v425_v8  ;;  %v427_v14 = vunpack.c.l.bf16 %v425_v8 }
  0x2b   : > { %v347_v22 = vpack.c.bf16 %v346_v17, %v345_v16 }
  0x2c   : > { %v429_v19 = vsub.f32 %v423_v5, %v427_v14 }
  0x2d   : > { %446 = vmatpush.bf16.msra.mxu1 %v803_v4  ;;  %402 = vmatpush.bf16.msra.mxu0 %v803_v4 }
  0x2e   : > { %485 = vmatpush.bf16.msra.mxu3 %v803_v4  ;;  %468 = vmatpush.bf16.msra.mxu2 %v803_v4  ;;  %v424_v4 = vpack.c.bf16 %v422_v3, %v422_v3 }
  0x30   : > { %595 = vmatmul.msk.bf16.vlgmr.msrb.gmra.mxu1 %vm182_vm1, %v264_v55  ;;  %v433_v9 = vunpack.c.l.b16 %v424_v4  ;;  %v426_v13 = vunpack.c.l.bf16 %v424_v4 }
  0x32   : > { %v435_v15 = vpack.c.b16 %v434_v10, %v433_v9  ;;  %v428_v18 = vsub.f32 %v422_v3, %v426_v13 }
  0x34   : > { %v430_v23 = vpack.c.bf16 %v429_v19, %v428_v18 }
  0x37   : > { %594 = vmatmul.msk.bf16.vlgmr.msrb.gmra.mxu0 %vm182_vm1, %v291_v2  ;;  %601 = vmatmul.msk.bf16.vlgmr.msrb.gmra.mxu3 %vm182_vm1, %v374_v6 }
  0x38   : > { %600 = vmatmul.msk.bf16.vlgmr.msrb.gmra.mxu2 %vm182_vm1, %v352_v7 }
  0x40   : > { %607 = vmatmul.msk.bf16.vlgmr.msra.gmra.mxu1 %vm182_vm1, %v435_v15 }
  0x47   : > { %602 = vmatmul.msk.bf16.vlgmr.msra.gmra.mxu0 %vm182_vm1, %v347_v22  ;;  %609 = vmatmul.msk.bf16.vlgmr.msra.gmra.mxu3 %vm182_vm1, %v430_v23 }
  0x48   : > { %608 = vmatmul.msk.bf16.vlgmr.msra.gmra.mxu2 %vm182_vm1, %v457_v24 }
  0x9d   : > { %v221_v25 = vpop.f32.mrf.mxu1 }
  0xa4   : > { %v199_v26 = vpop.f32.mrf.mxu0 }
  0xa5   : > { %v222_v27 = vadd.f32 %v221_v25, %v199_v26  ;;  %v223_v28 = vpop.f32.mrf.mxu1 }
  0xaa   : > { %v282_v29 = vpop.f32.mrf.mxu3 }
  0xab   : > { %v238_v31 = vpop.f32.mrf.mxu2 }
  0xac   : > { %v201_v30 = vpop.f32.mrf.mxu0  ;;  %v243_v32 = vadd.f32 %v238_v31, %v222_v27 }
  0xad   : > { %v224_v33 = vadd.f32 %v223_v28, %v201_v30  ;;  %v321_v35 = vpop.f32.mrf.mxu1 }
  0xae   : > { %246 = vst.msk [vmem:[%s867_s4] sm:$0xff] %vm245_vm2, %v243_v32 }
  0xb2   : > { %v284_v34 = vpop.f32.mrf.mxu3 }
  0xb3   : > { %v240_v36 = vpop.f32.mrf.mxu2 }
  0xb4   : > { %v304_v37 = vpop.f32.mrf.mxu0  ;;  %v244_v38 = vadd.f32 %v240_v36, %v224_v33 }
  0xb5   : > { %v305_v39 = vadd.f32 %v304_v37, %v282_v29  ;;  %v323_v45 = vpop.f32.mrf.mxu1 }
  0xb6   : > { %247 = vst.msk [vmem:[%s867_s4 + $0x20] sm:$0xff] %vm245_vm2, %v244_v38 }
  0xb7   : > { %v326_v40 = vadd.f32 %v321_v35, %v305_v39 }
  0xb9   : > { %596 = vst.msk [vmem:[%s867_s4 + $0x8] sm:$0xff] %vm245_vm2, %v326_v40 }
  0xba   : > { %v387_v41 = vpop.f32.mrf.mxu3 }
  0xbb   : > { %v365_v43 = vpop.f32.mrf.mxu2 }
  0xbc   : > { %v306_v42 = vpop.f32.mrf.mxu0  ;;  %v388_v47 = vadd.f32 %v387_v41, %v365_v43 }
  0xbd   : > { %v307_v44 = vadd.f32 %v306_v42, %v284_v34  ;;  %v448_v52 = vpop.f32.mrf.mxu1 }
  0xbf   : > { %v327_v46 = vadd.f32 %v323_v45, %v307_v44 }
  0xc1   : > { %597 = vst.msk [vmem:[%s867_s4 + $0x28] sm:$0xff] %vm245_vm2, %v327_v46 }
  0xc2   : > { %v389_v48 = vpop.f32.mrf.mxu3 }
  0xc3   : > { %v367_v49 = vpop.f32.mrf.mxu2 }
  0xc4   : > { %v404_v50 = vpop.f32.mrf.mxu0  ;;  %v390_v53 = vadd.f32 %v389_v48, %v367_v49 }
  0xc5   : > { %v409_v51 = vadd.f32 %v404_v50, %v388_v47  ;;  %v450_v60 = vpop.f32.mrf.mxu1 }
  0xc7   : > { %603 = vst.msk [vmem:[%s867_s4 + $0x10] sm:$0xff] %vm245_vm2, %v409_v51 }
  0xca   : > { %v487_v54 = vpop.f32.mrf.mxu3 }
  0xcb   : > { %v470_v56 = vpop.f32.mrf.mxu2 }
  0xcc   : > { %v406_v55 = vpop.f32.mrf.mxu0  ;;  %v471_v58 = vadd.f32 %v470_v56, %v448_v52 }
  0xcd   : > { %v410_v57 = vadd.f32 %v406_v55, %v390_v53 }
  0xce   : > { %v492_v59 = vadd.f32 %v487_v54, %v471_v58 }
  0xcf   : > { %604 = vst.msk [vmem:[%s867_s4 + $0x30] sm:$0xff] %vm245_vm2, %v410_v57 }
  0xd0   : > { %610 = vst.msk [vmem:[%s867_s4 + $0x18] sm:$0xff] %vm245_vm2, %v492_v59 }
  0xd2   : > { %v489_v63 = vpop.f32.mrf.mxu3 }
  0xd3   : > { %v472_v61 = vpop.f32.mrf.mxu2 }
  0xd4   : > { %v473_v62 = vadd.f32 %v472_v61, %v450_v60 }
  0xd6   : > { %v493_v0 = vadd.f32 %v489_v63, %v473_v62 }
  0xd8   : > { %611 = vst.msk [vmem:[%s867_s4 + $0x38] sm:$0xff] %vm245_vm2, %v493_v0 }
  0xd9   : > { %690 = shalt.err (!%p687_p3)
}
  0xda   : > { %s727_s27 = smov 128   ;;  %s728_s28 = smov 8  }
  0xdb   : > { %622 = dma.vmem_to_hbm [thread:$0]  (%p782_p5), %s512_s14, 1024, %s514_s16, %s498_s13, %s727_s27, %s727_s27, %s728_s28  }
  0xdc PF: > { %p628_p4 = scmp.ge.s32.totalorder %s725_s12, 2  ;;  %s528_s29 = sand.u32 1, %s713_s9  }
  0xdd   : > { %s529_s30 = scalar_lea.sflag [#allocation3], %s528_s29 }
  0xde   : > { %p625_p7 = pnand %p628_p4, %p786_p6 }
  0xe0   : > { %p626_p8 = pneg %p625_p7 }
  0xe2   : > { %708 = dma.done.wait (%p626_p8), %s529_s30, 1024  }
  0xe3   : > { %710 = vsyncadd (%p626_p8), %s529_s30, 4294966272  ;;  %p12_p9 = scmp.ge.s32.totalorder %s769_s15, 6   ;;  %s924_s9 = smov %s717_s10 }
  0xe4   : > { %s925_s10 = smov %s721_s11  ;;  %s926_s11 = smov %s780_s18 }
  0xe5   : > { %s927_s12 = smov %s769_s15  ;;  %14 = sbr.rel (!%p12_p9) target bundleno = 3 (0x3), region = 73 }
  0xea   :  { %535 = vsyncpa [#allocation3], 1 }
  0xeb   :  { %537 = vsyncpa [#allocation3 + $0x1], 1 }

</bundles_post_ra>
